<compile_context>
chip_gen: v5e
topology: v5e:2x2
jax: 0.10.0
libtpu: 0.0.40
codegen_flags: <defaults>
</compile_context>

<pallas_src>
import functools

import jax
import jax.numpy as jnp
from jax import lax
from jax.experimental import pallas as pl
from jax.experimental.pallas import tpu as pltpu

_TWO_PI = 6.283185307179586
_GOLDEN = -1640531527            # 0x9E3779B9 as signed int32


def _mix32(h):
    """lowbias32-style integer finalizer on int32 (wrap-around semantics).

    Logical right shifts are emulated with (arithmetic shift & mask) so only
    plain int32 ops are needed; bit-exact with the usual uint32 formulation.
    """
    h = h ^ ((h >> 16) & 0xFFFF)
    h = h * 2146252077             # 0x7FEB352D
    h = h ^ ((h >> 15) & 0x1FFFF)
    h = h * (-2073319797)          # 0x846CA68B as signed int32
    h = h ^ ((h >> 16) & 0xFFFF)
    return h


def _bits16_to_12(b16):
    """16 random bits -> float32 in [1, 2) (bits land in the top of the mantissa)."""
    fbits = (b16 << 7) | 0x3F800000
    return lax.bitcast_convert_type(fbits, jnp.float32)


def _gaussian_noise_kernel(seed_ref, x_ref, o_ref, *, mean, std):
    tr, lane = x_ref.shape
    # Per-tile seed: hash (seed, tile index) so the in-tile counter stays small
    # and never wraps int32 even for huge tensors (review correctness concern).
    seed_mix = _mix32(seed_ref[0] ^ (pl.program_id(0) * _GOLDEN))

    neg_two_var = jnp.float32(-2.0 * float(std) * float(std))  # static: std folded into radius
    mean_f = jnp.float32(mean)

    # TODO(synk): on v7x (3.2 TB/s HBM) this kernel becomes compute-bound; a
    # VPU-only polynomial inverse-CDF would beat Box-Muller there (v5e/v6e stay
    # HBM-bound, so Box-Muller is effectively free on those).

    if lane % 256 == 0:
        # Box-Muller pair: ONE hash per pair, 32 bits split into two 16-bit
        # uniforms; the cos / sin normals fill the left / right lane halves.
        # 16-bit u1 truncates |z| at ~4.7*std -- fine for augmentation noise.
        hl = lane // 2
        row = lax.broadcasted_iota(jnp.int32, (tr, hl), 0)
        col = lax.broadcasted_iota(jnp.int32, (tr, hl), 1)
        h = _mix32(row * hl + col + seed_mix)
        u1 = jnp.float32(2.0) - _bits16_to_12(h & 0xFFFF)                 # (0, 1]: log-safe
        theta = jnp.float32(_TWO_PI) * (_bits16_to_12((h >> 16) & 0xFFFF)
                                        - jnp.float32(1.0))               # [0, 2*pi)
        r = jnp.sqrt(neg_two_var * jnp.log(u1))                           # radius pre-scaled by std
        # Two direct half-stores (no concat temporary); f32 math, single cast.
        o_ref[:, :hl] = (x_ref[:, :hl].astype(jnp.float32)
                         + r * jnp.cos(theta) + mean_f).astype(o_ref.dtype)
        o_ref[:, hl:] = (x_ref[:, hl:].astype(jnp.float32)
                         + r * jnp.sin(theta) + mean_f).astype(o_ref.dtype)
    else:
        # Narrow (lane == 128) fallback: cos branch only, still one hash/element.
        row = lax.broadcasted_iota(jnp.int32, (tr, lane), 0)
        col = lax.broadcasted_iota(jnp.int32, (tr, lane), 1)
        h = _mix32(row * lane + col + seed_mix)
        u1 = jnp.float32(2.0) - _bits16_to_12(h & 0xFFFF)
        theta = jnp.float32(_TWO_PI) * (_bits16_to_12((h >> 16) & 0xFFFF)
                                        - jnp.float32(1.0))
        z = jnp.sqrt(neg_two_var * jnp.log(u1)) * jnp.cos(theta)
        o_ref[...] = (x_ref[...].astype(jnp.float32) + z + mean_f).astype(o_ref.dtype)


def _add_noise_pallas(x, seed, *, mean, std):
    """x + N(0,1)*std + mean via a tiled, pipelined elementwise Pallas kernel."""
    orig_shape = x.shape
    total = x.size

    # Lane-dense slab: last dim a large multiple of 128 (>=256 preferred so the
    # paired Box-Muller branch is taken).
    lane = next((c for c in (1024, 512, 256, 128) if total % c == 0), 0)
    if lane:
        flat = x.reshape(-1)
    else:
        # TODO(synk): ragged totals still pad + slice outside the kernel (one
        # extra HBM pass each way); an in-kernel masked-tail path would remove it.
        lane = 128
        padded = -(-total // lane) * lane
        flat = jnp.pad(x.reshape(-1), (0, padded - total))
    rows = flat.size // lane
    x2 = flat.reshape(rows, lane)

    # ~3 MiB tiles: measured elementwise kernels reach ~85% of HBM roofline at
    # 2-4 MiB, and double-buffered in+out (4 live tiles) stays ~12 MiB, within
    # the 32 MiB scoped limit requested below (fits v5e/v6e/v7x).
    bytes_per_row = lane * x2.dtype.itemsize
    tr_cap = max(8, ((3 << 20) // bytes_per_row) // 8 * 8)
    if rows > tr_cap:
        tr = tr_cap
    elif rows >= 16:
        # At least 2 grid tiles so "parallel" can shard rows across v7x's 2 TCs.
        tr = max(8, ((-(-rows // 2)) + 7) // 8 * 8)
    else:
        tr = rows                       # equals full dim -> satisfies (8,128) rule
    grid = -(-rows // tr)

    kernel = functools.partial(_gaussian_noise_kernel, mean=mean, std=std)
    out2 = pl.pallas_call(
        kernel,
        out_shape=jax.ShapeDtypeStruct(x2.shape, x2.dtype),
        grid_spec=pltpu.PrefetchScalarGridSpec(
            num_scalar_prefetch=1,                 # seed lives in SMEM
            grid=(grid,),
            in_specs=[pl.BlockSpec((tr, lane), lambda i, s: (i, 0))],
            out_specs=pl.BlockSpec((tr, lane), lambda i, s: (i, 0)),
        ),
        compiler_params=pltpu.CompilerParams(
            dimension_semantics=("parallel",),     # independent elementwise tiles
            vmem_limit_bytes=32 * 1024 * 1024,
        ),
    )(seed, x2)
    # input_output_aliases intentionally omitted: under lax.cond the input is
    # not donated, so XLA would insert a copy anyway.

    out = out2.reshape(-1)
    if out.size != total:
        out = out[:total]
    return out.reshape(orig_shape)


@functools.partial(jax.jit, static_argnames=("mean", "std", "probability"))
def gaussian_noise_forward(x, key, *, mean: float, std: float, probability: float):
    """Equivalent of GaussianNoise(mean, std, probability).forward(x) for NCHW x."""
    coin_key, noise_key = jax.random.split(key)
    apply_noise = jax.random.uniform(coin_key) < probability   # torch.rand(1) < p
    seed = jax.random.randint(noise_key, (1,), 0, jnp.iinfo(jnp.int32).max,
                              dtype=jnp.int32)
    # With probability 1-p skip the kernel entirely (no HBM traffic, no compute).
    return lax.cond(
        apply_noise,
        lambda xv: _add_noise_pallas(xv, seed, mean=mean, std=std),
        lambda xv: xv,
        x,
    )


if __name__ == "__main__":
    key = jax.random.PRNGKey(0)
    xkey, k_force, k_coin = jax.random.split(key, 3)

    # Small NCHW input consistent with an image-denoising dataloader transform.
    x = jax.random.normal(xkey, (2, 4, 16, 16), dtype=jnp.float32)
    mean, std, probability = 0.0, 0.1, 0.5

    # probability=1.0 forces the noisy branch so the Pallas kernel executes.
    y = gaussian_noise_forward(x, k_force, mean=mean, std=std, probability=1.0)
    y = jax.block_until_ready(y)
    assert y.shape == x.shape and y.dtype == x.dtype
    noise = y - x - mean
    assert float(jnp.abs(jnp.mean(noise))) < 0.05
    assert 0.03 < float(jnp.std(noise)) < 0.3

    # Stochastic application (one Bernoulli coin per call), as in the module.
    y2 = gaussian_noise_forward(x, k_coin, mean=mean, std=std, probability=probability)
    y2 = jax.block_until_ready(y2)
    assert y2.shape == x.shape and y2.dtype == x.dtype

    print("KERNEL_OK")
</pallas_src>

<mosaic_0001>
module attributes {stable_mosaic.version = 11 : i64} {
  func.func @_gaussian_noise_kernel(%arg0: i32, %arg1: memref<1xi32, #tpu.memory_space<smem>>, %arg2: memref<2x1024xf32, #tpu.memory_space<vmem>>, %arg3: memref<2x1024xf32, #tpu.memory_space<vmem>>) attributes {dimension_semantics = [#tpu.dimension_semantics<parallel>], iteration_bounds = array<i64: 1>, scalar_prefetch = 1 : i64, scratch_operands = 0 : i64, tpu.core_type = #tpu.core_type<tc>, window_params = [{transform_indices = @transform_0, window_bounds = array<i64: 2, 1024>}, {transform_indices = @transform_1, window_bounds = array<i64: 2, 1024>}]} {
    %c0 = arith.constant 0 : index
    %0 = memref.load %arg1[%c0] : memref<1xi32, #tpu.memory_space<smem>>
    %c-1640531527_i32 = arith.constant -1640531527 : i32
    %1 = arith.muli %arg0, %c-1640531527_i32 : i32
    %2 = arith.xori %0, %1 : i32
    %c16_i32 = arith.constant 16 : i32
    %3 = arith.shrsi %2, %c16_i32 : i32
    %c65535_i32 = arith.constant 65535 : i32
    %4 = arith.andi %3, %c65535_i32 : i32
    %5 = arith.xori %2, %4 : i32
    %c2146252077_i32 = arith.constant 2146252077 : i32
    %6 = arith.muli %5, %c2146252077_i32 : i32
    %c15_i32 = arith.constant 15 : i32
    %7 = arith.shrsi %6, %c15_i32 : i32
    %c131071_i32 = arith.constant 131071 : i32
    %8 = arith.andi %7, %c131071_i32 : i32
    %9 = arith.xori %6, %8 : i32
    %c-2073319797_i32 = arith.constant -2073319797 : i32
    %10 = arith.muli %9, %c-2073319797_i32 : i32
    %c16_i32_0 = arith.constant 16 : i32
    %11 = arith.shrsi %10, %c16_i32_0 : i32
    %c65535_i32_1 = arith.constant 65535 : i32
    %12 = arith.andi %11, %c65535_i32_1 : i32
    %13 = arith.xori %10, %12 : i32
    %14 = tpu.iota {dimensions = array<i32: 0>} : vector<2x512xi32>
    %15 = tpu.iota {dimensions = array<i32: 1>} : vector<2x512xi32>
    %c512_i32 = arith.constant 512 : i32
    %16 = vector.broadcast %c512_i32 : i32 to vector<2x512xi32>
    %17 = arith.muli %14, %16 : vector<2x512xi32>
    %18 = arith.addi %17, %15 : vector<2x512xi32>
    %19 = vector.broadcast %13 : i32 to vector<2x512xi32>
    %20 = arith.addi %18, %19 : vector<2x512xi32>
    %c16_i32_2 = arith.constant 16 : i32
    %21 = vector.broadcast %c16_i32_2 : i32 to vector<2x512xi32>
    %22 = arith.shrsi %20, %21 : vector<2x512xi32>
    %c65535_i32_3 = arith.constant 65535 : i32
    %23 = vector.broadcast %c65535_i32_3 : i32 to vector<2x512xi32>
    %24 = arith.andi %22, %23 : vector<2x512xi32>
    %25 = arith.xori %20, %24 : vector<2x512xi32>
    %c2146252077_i32_4 = arith.constant 2146252077 : i32
    %26 = vector.broadcast %c2146252077_i32_4 : i32 to vector<2x512xi32>
    %27 = arith.muli %25, %26 : vector<2x512xi32>
    %c15_i32_5 = arith.constant 15 : i32
    %28 = vector.broadcast %c15_i32_5 : i32 to vector<2x512xi32>
    %29 = arith.shrsi %27, %28 : vector<2x512xi32>
    %c131071_i32_6 = arith.constant 131071 : i32
    %30 = vector.broadcast %c131071_i32_6 : i32 to vector<2x512xi32>
    %31 = arith.andi %29, %30 : vector<2x512xi32>
    %32 = arith.xori %27, %31 : vector<2x512xi32>
    %c-2073319797_i32_7 = arith.constant -2073319797 : i32
    %33 = vector.broadcast %c-2073319797_i32_7 : i32 to vector<2x512xi32>
    %34 = arith.muli %32, %33 : vector<2x512xi32>
    %c16_i32_8 = arith.constant 16 : i32
    %35 = vector.broadcast %c16_i32_8 : i32 to vector<2x512xi32>
    %36 = arith.shrsi %34, %35 : vector<2x512xi32>
    %c65535_i32_9 = arith.constant 65535 : i32
    %37 = vector.broadcast %c65535_i32_9 : i32 to vector<2x512xi32>
    %38 = arith.andi %36, %37 : vector<2x512xi32>
    %39 = arith.xori %34, %38 : vector<2x512xi32>
    %c65535_i32_10 = arith.constant 65535 : i32
    %40 = vector.broadcast %c65535_i32_10 : i32 to vector<2x512xi32>
    %41 = arith.andi %39, %40 : vector<2x512xi32>
    %c7_i32 = arith.constant 7 : i32
    %42 = vector.broadcast %c7_i32 : i32 to vector<2x512xi32>
    %43 = arith.shli %41, %42 : vector<2x512xi32>
    %c1065353216_i32 = arith.constant 1065353216 : i32
    %44 = vector.broadcast %c1065353216_i32 : i32 to vector<2x512xi32>
    %45 = arith.ori %43, %44 : vector<2x512xi32>
    %46 = tpu.bitcast %45 : vector<2x512xi32> -> vector<2x512xf32>
    %cst = arith.constant 2.000000e+00 : f32
    %47 = vector.broadcast %cst : f32 to vector<2x512xf32>
    %48 = arith.subf %47, %46 : vector<2x512xf32>
    %c16_i32_11 = arith.constant 16 : i32
    %49 = vector.broadcast %c16_i32_11 : i32 to vector<2x512xi32>
    %50 = arith.shrsi %39, %49 : vector<2x512xi32>
    %c65535_i32_12 = arith.constant 65535 : i32
    %51 = vector.broadcast %c65535_i32_12 : i32 to vector<2x512xi32>
    %52 = arith.andi %50, %51 : vector<2x512xi32>
    %c7_i32_13 = arith.constant 7 : i32
    %53 = vector.broadcast %c7_i32_13 : i32 to vector<2x512xi32>
    %54 = arith.shli %52, %53 : vector<2x512xi32>
    %c1065353216_i32_14 = arith.constant 1065353216 : i32
    %55 = vector.broadcast %c1065353216_i32_14 : i32 to vector<2x512xi32>
    %56 = arith.ori %54, %55 : vector<2x512xi32>
    %57 = tpu.bitcast %56 : vector<2x512xi32> -> vector<2x512xf32>
    %cst_15 = arith.constant 1.000000e+00 : f32
    %58 = vector.broadcast %cst_15 : f32 to vector<2x512xf32>
    %59 = arith.subf %57, %58 : vector<2x512xf32>
    %cst_16 = arith.constant 6.28318548 : f32
    %60 = vector.broadcast %cst_16 : f32 to vector<2x512xf32>
    %61 = arith.mulf %60, %59 : vector<2x512xf32>
    %62 = math.log %48 : vector<2x512xf32>
    %cst_17 = arith.constant -2.000000e-02 : f32
    %63 = vector.broadcast %cst_17 : f32 to vector<2x512xf32>
    %64 = arith.mulf %63, %62 : vector<2x512xf32>
    %65 = math.sqrt %64 : vector<2x512xf32>
    %c0_18 = arith.constant 0 : index
    %c0_19 = arith.constant 0 : index
    %66 = vector.load %arg2[%c0_18, %c0_19] : memref<2x1024xf32, #tpu.memory_space<vmem>>, vector<2x512xf32>
    %67 = math.cos %61 : vector<2x512xf32>
    %68 = arith.mulf %65, %67 : vector<2x512xf32>
    %69 = arith.addf %66, %68 : vector<2x512xf32>
    %cst_20 = arith.constant 0.000000e+00 : f32
    %70 = vector.broadcast %cst_20 : f32 to vector<2x512xf32>
    %71 = arith.addf %69, %70 : vector<2x512xf32>
    %c0_21 = arith.constant 0 : index
    %c0_22 = arith.constant 0 : index
    %72 = vector.load %arg3[%c0_21, %c0_22] : memref<2x1024xf32, #tpu.memory_space<vmem>>, vector<2x512xf32>
    tpu.vector_store %arg3[%c0_21, %c0_22], %71 {strides = array<i32>} : memref<2x1024xf32, #tpu.memory_space<vmem>>, vector<2x512xf32>,
    %c0_23 = arith.constant 0 : index
    %c512 = arith.constant 512 : index
    %73 = vector.load %arg2[%c0_23, %c512] : memref<2x1024xf32, #tpu.memory_space<vmem>>, vector<2x512xf32>
    %74 = math.sin %61 : vector<2x512xf32>
    %75 = arith.mulf %65, %74 : vector<2x512xf32>
    %76 = arith.addf %73, %75 : vector<2x512xf32>
    %cst_24 = arith.constant 0.000000e+00 : f32
    %77 = vector.broadcast %cst_24 : f32 to vector<2x512xf32>
    %78 = arith.addf %76, %77 : vector<2x512xf32>
    %c0_25 = arith.constant 0 : index
    %c512_26 = arith.constant 512 : index
    %79 = vector.load %arg3[%c0_25, %c512_26] : memref<2x1024xf32, #tpu.memory_space<vmem>>, vector<2x512xf32>
    tpu.vector_store %arg3[%c0_25, %c512_26], %78 {strides = array<i32>} : memref<2x1024xf32, #tpu.memory_space<vmem>>, vector<2x512xf32>,
    return
  }
  func.func @transform_0(%arg0: i32, %arg1: memref<1xi32, #tpu.memory_space<smem>>) -> (i32, i32) {
    %c0_i32 = arith.constant 0 : i32
    %c0_i32_0 = arith.constant 0 : i32
    return %arg0, %c0_i32 : i32, i32
  }
  func.func @transform_1(%arg0: i32, %arg1: memref<1xi32, #tpu.memory_space<smem>>) -> (i32, i32) {
    %c0_i32 = arith.constant 0 : i32
    %c0_i32_0 = arith.constant 0 : i32
    return %arg0, %c0_i32 : i32, i32
  }
}

</mosaic_0001>

<bundles_post_ra>
// kernel: branch_1_fun.1
= control target key start
LH: loop header
LB: loop body
LE: loop exit
PB: predicated region body
PF: predicated region fallthrough
CT: control target
= control target key end

     0   :  { %v24_v0 = vlaneseq  ;;  %v1541_v62 = vmov 683565275   ;;  %s2217_s0 = inlined_call_operand.<no memory space> [shape: s32[1], index: 0, kind: input, shape index: {}]   ;;  %s2218_s1 = inlined_call_operand.vmem [shape: f32[2,1024], index: 1, kind: input, shape index: {}]   ;;  %s2219_s2 = inlined_call_operand.vmem [shape: f32[2,1024], index: 2, kind: output, shape index: {}]  }
   0x1   :  { %s13_s11 = sshra.s32 %s2217_s0, 16 }
   0x2   :  { %s14_s12 = sand.u32 65535, %s13_s11  ;;  %v25_v1 = vshrl.u32 %v24_v0, 7  ;;  %v27_v2 = vand.u32 127, %v24_v0  ;;  %v1542_v0 = vmov 2475754826  }
   0x3   :  { %s15_s15 = sxor.u32 %s14_s12, %s2217_s0 }
   0x4   :  { %s16_s16 = smul.u32 2146252077, %s15_s15  ;;  %v28_v3 = vadd.s32 128, %v27_v2  ;;  %v31_v4 = vmul.u32 512, %v25_v1  ;;  %v29_v12 = vadd.s32 256, %v27_v2  ;;  %v30_v43 = vadd.s32 384, %v27_v2 }
   0x6   :  { %s17_s17 = sshra.s32 %s16_s16, 15  ;;  %v32_v5 = vadd.s32 %v31_v4, %v27_v2  ;;  %v33_v6 = vadd.s32 %v31_v4, %v28_v3  ;;  %v34_v17 = vadd.s32 %v31_v4, %v29_v12  ;;  %v35_v48 = vadd.s32 %v31_v4, %v30_v43 }
   0x7   :  { %s18_s18 = sand.u32 131071, %s17_s17  ;;  %v1543_v4 = vmov 2131351028   ;;  %v1545_v12 = vmov 920167782  }
   0x8   :  { %s19_s19 = sxor.u32 %s18_s18, %s16_s16 }
   0x9   :  { %s20_s20 = smul.u32 2221647499, %s19_s19 }
   0xb   :  { %s21_s21 = sshra.s32 %s20_s20, 16 }
   0xc   :  { %s22_s22 = sand.u32 65535, %s21_s21 }
   0xd   :  { %s23_s23 = sxor.u32 %s22_s22, %s20_s20 }
   0xe   :  { %v36_v7 = vstv %s23_s23 }
   0xf   :  { %v37_v8 = vadd.s32 %v36_v7, %v32_v5  ;;  %v38_v9 = vadd.s32 %v36_v7, %v33_v6  ;;  %v39_v22 = vadd.s32 %v36_v7, %v34_v17  ;;  %v40_v51 = vadd.s32 %v36_v7, %v35_v48 }
  0x10   :  { %v1544_v6 = vmov 2102212464  }
  0x11   :  { %v1474_v10 = vshrl.u32 %v37_v8, 16  ;;  %v1475_v11 = vshrl.u32 %v38_v9, 16  ;;  %v1476_v27 = vshrl.u32 %v39_v22, 16  ;;  %v1477_v57 = vshrl.u32 %v40_v51, 16 }
  0x13   :  { %v49_v13 = vxor.u32 %v1474_v10, %v37_v8  ;;  %v50_v14 = vxor.u32 %v1475_v11, %v38_v9  ;;  %v51_v32 = vxor.u32 %v1476_v27, %v39_v22 }
  0x15   :  { %v53_v15 = vmul.u32 2146252077, %v49_v13  ;;  %v54_v16 = vmul.u32 2146252077, %v50_v14  ;;  %v55_v36 = vmul.u32 2146252077, %v51_v32  ;;  %v1595_v14 = vxor.u32 %v1477_v57, %v40_v51 }
  0x17   :  { %v1478_v18 = vshrl.u32 %v53_v15, 15  ;;  %v1479_v19 = vshrl.u32 %v54_v16, 15  ;;  %v1480_v40 = vshrl.u32 %v55_v36, 15 }
  0x19   :  { %v65_v20 = vxor.u32 %v1478_v18, %v53_v15  ;;  %v66_v21 = vxor.u32 %v1479_v19, %v54_v16  ;;  %v67_v45 = vxor.u32 %v1480_v40, %v55_v36  ;;  %v1546_v19 = vmov 1326507024  }
  0x1b   :  { %v69_v23 = vmul.u32 2221647499, %v65_v20  ;;  %v70_v24 = vmul.u32 2221647499, %v66_v21  ;;  %v71_v50 = vmul.u32 2221647499, %v67_v45 }
  0x1d   :  { %v1482_v25 = vshrl.u32 %v69_v23, 16  ;;  %v1483_v26 = vshrl.u32 %v70_v24, 16  ;;  %v1484_v53 = vshrl.u32 %v71_v50, 16 }
  0x1f   :  { %v1569_v28 = vxor.u32 %v1482_v25, %v69_v23  ;;  %v1571_v29 = vxor.u32 %v1483_v26, %v70_v24  ;;  %v1582_v59 = vxor.u32 %v1484_v53, %v71_v50  ;;  %v56_v25 = vmul.u32 2146252077, %v1595_v14 }
  0x21   :  { %v1486_v30 = vshrl.u32 %v1569_v28, 16  ;;  %v1487_v31 = vshrl.u32 %v1571_v29, 16  ;;  %v1488_v9 = vshrl.u32 %v1582_v59, 16 }
  0x23   :  { %v113_v33 = vshll.u32 %v1486_v30, 7  ;;  %v114_v35 = vshll.u32 %v1487_v31, 7  ;;  %v115_v23 = vshll.u32 %v1488_v9, 7 }
  0x25   :  { %v117_v34 = vor.u32 1065353216, %v113_v33  ;;  %v118_v39 = vor.u32 1065353216, %v114_v35  ;;  %v119_v33 = vor.u32 1065353216, %v115_v23  ;;  %v1547_v23 = vmov 0  }
  0x27   :  { %v1490_v37 = vadd.f32 -1.0, %v117_v34  ;;  %v1491_v44 = vadd.f32 -1.0, %v118_v39  ;;  %v1620_v50 = vadd.f32 -1.0, %v119_v33 }
  0x29   :  { %v1575_v38 = vmul.f32 6.2831855, %v1490_v37  ;;  %v1578_v49 = vmul.f32 6.2831855, %v1491_v44  ;;  %v1610_v37 = vshrl.u32 %v56_v25, 15 }
  0x2b   :  { %v197_v41 = vand.u32 2139095040, %v1575_v38  ;;  %v351_v52 = vand.u32 2139095040, %v1578_v49  ;;  %v194_v54 = vand.u32 2147483647, %v1575_v38  ;;  %v348_v36 = vand.u32 2147483647, %v1578_v49 }
  0x2d   :  { %v198_v42 = vshrl.u32 %v197_v41, 23  ;;  %v352_v58 = vshrl.u32 %v351_v52, 23  ;;  %v201_v61 = vand.u32 8388607, %v194_v54  ;;  %v1625_v53 = vand.u32 8388607, %v348_v36 }
  0x2f   :  { %v1494_v46 = vadd.s32 4294967169, %v198_v42  ;;  %v1497_v8 = vadd.s32 4294967169, %v352_v58  ;;  %v202_v15 = vor.u32 8388608, %v201_v61 }
  0x31   :  { %v204_v47 = vadd.s32 1, %v1494_v46  ;;  %v358_v22 = vadd.s32 1, %v1497_v8  ;;  %v1601_v30 = vshll.u32 %v202_v15, 8 }
  0x33   :  { %vm205_vm0 = vcmp.gt.s32.totalorder %v204_v47, 0  ;;  %vm359_vm5 = vcmp.gt.s32.totalorder %v358_v22, 0  ;;  %v244_v40 = vshrl.u32 %v1601_v30, 16  ;;  %v243_v43 = vand.u32 65535, %v1601_v30 }
  0x34   :  { %v206_v55 = vsel %vm205_vm0, %v204_v47, 0  ;;  %v360_v44 = vsel %vm359_vm5, %v358_v22, 0 }
  0x35   :  { %v208_v56 = vand.u32 31, %v206_v55  ;;  %v207_v3 = vshrl.u32 %v206_v55, 5 }
  0x37   :  { %v209_v60 = vsub.s32 32, %v208_v56  ;;  %v211_v63 = vshll.u32 %v1541_v62, %v208_v56  ;;  %v214_v2 = vshll.u32 %v1542_v0, %v208_v56  ;;  %v220_v7 = vshll.u32 %v1544_v6, %v208_v56 }
  0x38   :  { %v217_v10 = vshll.u32 %v1543_v4, %v208_v56  ;;  %v223_v18 = vshll.u32 %v1545_v12, %v208_v56  ;;  %vm226_vm1 = vcmp.lt.s32.totalorder %v207_v3, 1  ;;  %vm228_vm2 = vcmp.lt.s32.totalorder %v207_v3, 3 }
  0x39   :  { %v212_v1 = vshrl.u32 %v1542_v0, %v209_v60  ;;  %v215_v5 = vshrl.u32 %v1543_v4, %v209_v60  ;;  %v218_v11 = vshrl.u32 %v1544_v6, %v209_v60  ;;  %v221_v13 = vshrl.u32 %v1545_v12, %v209_v60 }
  0x3a   :  { %v224_v20 = vshrl.u32 %v1546_v19, %v209_v60  ;;  %vm229_vm3 = vcmp.lt.s32.totalorder %v207_v3, 4  ;;  %vm227_vm4 = vcmp.lt.s32.totalorder %v207_v3, 2  ;;  %v210_v31 = vshrl.u32 %v1541_v62, %v209_v60 }
  0x3b   :  { %v213_v16 = vor.u32 %v212_v1, %v211_v63  ;;  %v216_v17 = vor.u32 %v215_v5, %v214_v2  ;;  %v222_v21 = vor.u32 %v221_v13, %v220_v7  ;;  %v219_v24 = vor.u32 %v218_v11, %v217_v10 }
  0x3c   :  { %v225_v26 = vor.u32 %v224_v20, %v223_v18  ;;  %v362_v63 = vand.u32 31, %v360_v44  ;;  %v1630_v11 = vshrl.u32 %v360_v44, 5 }
  0x3d   :  { %v234_v27 = vsel %vm226_vm1, %v213_v16, %v216_v17  ;;  %v235_v32 = vsel %vm229_vm3, %v222_v21, 920167782  ;;  %v231_v34 = vsel %vm229_vm3, %v219_v24, 2102212464  ;;  %v238_v41 = vsel %vm226_vm1, %v216_v17, %v219_v24 }
  0x3e   :  { %v236_v35 = vsel %vm228_vm2, %v219_v24, %v235_v32  ;;  %v239_v42 = vsel %vm229_vm3, %v225_v26, 1326507024  ;;  %v230_v45 = vsel %vm226_vm1, %v210_v31, %v213_v16  ;;  %v232_v46 = vsel %vm228_vm2, %v216_v17, %v231_v34 }
  0x3f   :  { %v237_v39 = vsel %vm227_vm4, %v234_v27, %v236_v35  ;;  %v240_v47 = vsel %vm228_vm2, %v222_v21, %v239_v42  ;;  %v1628_v58 = vsel %vm227_vm4, %v230_v45, %v232_v46  ;;  %v1632_v20 = vsub.s32 32, %v362_v63 }
  0x40   :  { %v267_v48 = vand.u32 65535, %v237_v39  ;;  %v241_v51 = vsel %vm227_vm4, %v238_v41, %v240_v47  ;;  %v268_v52 = vshrl.u32 %v237_v39, 16  ;;  %v365_v31 = vshll.u32 %v1541_v62, %v362_v63 }
  0x41   :  { %v245_v55 = vand.u32 65535, %v241_v51  ;;  %v246_v56 = vshrl.u32 %v241_v51, 16  ;;  %v368_v34 = vshll.u32 %v1542_v0, %v362_v63  ;;  %v369_v41 = vshrl.u32 %v1543_v4, %v1632_v20 }
  0x42   :  { %v271_v57 = vmul.u32 %v267_v48, %v244_v40  ;;  %v269_v60 = vmul.u32 %v267_v48, %v243_v43  ;;  %v270_v61 = vmul.u32 %v268_v52, %v243_v43  ;;  %v272_v7 = vmul.u32 %v268_v52, %v244_v40 }
  0x43   :  { %v247_v1 = vmul.u32 %v245_v55, %v243_v43  ;;  %v248_v2 = vmul.u32 %v246_v56, %v243_v43  ;;  %v249_v5 = vmul.u32 %v245_v55, %v244_v40  ;;  %v250_v8 = vmul.u32 %v246_v56, %v244_v40 }
  0x44   :  { %v273_v9 = vshll.u32 %v270_v61, 16  ;;  %v275_v10 = vshll.u32 %v271_v57, 16  ;;  %v274_v16 = vshrl.u32 %v270_v61, 16  ;;  %v276_v17 = vshrl.u32 %v271_v57, 16 }
  0x45   :  { %v251_v13 = vshll.u32 %v248_v2, 16  ;;  %v253_v15 = vshll.u32 %v249_v5, 16  ;;  %v252_v18 = vshrl.u32 %v248_v2, 16  ;;  %v254_v21 = vshrl.u32 %v249_v5, 16 }
  0x46   :  { %vm277_vm6 = vc.u32 %v269_v60, %v273_v9  ;;  %v279_v3 = vadd.s32 %v273_v9, %v269_v60  ;;  %v366_v40 = vshrl.u32 %v1542_v0, %v1632_v20  ;;  %v371_v43 = vshll.u32 %v1543_v4, %v362_v63 }
  0x47   :  { %vm255_vm7 = vc.u32 %v247_v1, %v251_v13  ;;  %v257_v22 = vadd.s32 %v251_v13, %v247_v1  ;;  %v278_v24 = vsel %vm277_vm6, 1, %v1547_v23  ;;  %v372_v44 = vshrl.u32 %v1544_v6, %v1632_v20 }
  0x48   :  { %v256_v26 = vsel %vm255_vm7, 1, %v1547_v23  ;;  %v280_v27 = vadd.s32 %v278_v24, %v272_v7  ;;  %vm281_vm8 = vc.u32 %v279_v3, %v275_v10  ;;  %v374_v45 = vshll.u32 %v1544_v6, %v362_v63 }
  0x49   :  { %v258_v32 = vadd.s32 %v256_v26, %v250_v8  ;;  %vm259_vm9 = vc.u32 %v257_v22, %v253_v15  ;;  %v282_v33 = vsel %vm281_vm8, 1, %v1547_v23  ;;  %v1648_v46 = vadd.s32 %v279_v3, %v275_v10 }
  0x4a   :  { %v260_v35 = vsel %vm259_vm9, 1, %v1547_v23  ;;  %v284_v39 = vadd.s32 %v282_v33, %v280_v27  ;;  %v1650_v48 = vor.u32 %v366_v40, %v365_v31  ;;  %v375_v51 = vshrl.u32 %v1545_v12, %v1632_v20 }
  0x4b   :  { %v262_v42 = vadd.s32 %v260_v35, %v258_v32  ;;  %v1654_v55 = vor.u32 %v369_v41, %v368_v34  ;;  %v377_v56 = vshll.u32 %v1545_v12, %v362_v63  ;;  %v378_v57 = vshrl.u32 %v1546_v19, %v1632_v20 }
  0x4c   :  { %v285_v47 = vadd.s32 %v284_v39, %v274_v16  ;;  %v287_v61 = vmul.u32 %v1601_v30, %v1628_v58  ;;  %v376_v1 = vor.u32 %v375_v51, %v374_v45  ;;  %vm380_vm10 = vcmp.lt.s32.totalorder %v1630_v11, 1 }
  0x4d   :  { %v263_v52 = vadd.s32 %v262_v42, %v252_v18  ;;  %v373_v5 = vor.u32 %v372_v44, %v371_v43  ;;  %v379_v7 = vor.u32 %v378_v57, %v377_v56  ;;  %vm383_vm11 = vcmp.lt.s32.totalorder %v1630_v11, 4 }
  0x4e   :  { %v286_v60 = vadd.s32 %v285_v47, %v276_v17  ;;  %v1666_v8 = vmul.f32 6.2831855, %v1620_v50  ;;  %v356_v9 = vor.u32 8388608, %v1625_v53  ;;  %vm382_vm12 = vcmp.lt.s32.totalorder %v1630_v11, 3 }
  0x4f   :  { %v1662_v2 = vadd.s32 %v263_v52, %v254_v21  ;;  %v1673_v30 = vxor.u32 %v1610_v37, %v56_v25  ;;  %vm381_vm14 = vcmp.lt.s32.totalorder %v1630_v11, 2  ;;  %v388_v50 = vsel %vm380_vm10, %v1650_v48, %v1654_v55 }
  0x50   :  { %v290_v63 = vadd.s32 1, %v286_v60  ;;  %v389_v53 = vsel %vm383_vm11, %v376_v1, 920167782  ;;  %v392_v25 = vsel %vm380_vm10, %v1654_v55, %v373_v5  ;;  %v393_v37 = vsel %vm383_vm11, %v379_v7, 1326507024 }
  0x51   :  { %vm289_vm13 = vc.u32 %v1662_v2, %v1648_v46  ;;  %v390_v14 = vsel %vm382_vm12, %v373_v5, %v389_v53  ;;  %v394_v15 = vsel %vm382_vm12, %v376_v1, %v393_v37  ;;  %v1695_v16 = vshll.u32 %v356_v9, 8 }
  0x52   :  { %v291_v58 = vsel %vm289_vm13, %v290_v63, %v286_v60  ;;  %v391_v13 = vsel %vm381_vm14, %v388_v50, %v390_v14  ;;  %v505_v17 = vand.u32 2139095040, %v1666_v8  ;;  %v72_v18 = vmul.u32 2221647499, %v1673_v30 }
  0x53   :  { %v292_v10 = vadd.s32 %v291_v58, %v287_v61  ;;  %v395_v21 = vsel %vm381_vm14, %v392_v25, %v394_v15  ;;  %v422_v22 = vshrl.u32 %v391_v13, 16  ;;  %v397_v24 = vand.u32 65535, %v1695_v16 }
  0x54   :  { %v398_v26 = vshrl.u32 %v1695_v16, 16  ;;  %v399_v27 = vand.u32 65535, %v395_v21  ;;  %v400_v31 = vshrl.u32 %v395_v21, 16  ;;  %v421_v33 = vand.u32 65535, %v391_v13 }
  0x55   :  { %v293_v3 = vadd.s32 536870912, %v292_v10  ;;  %v506_v40 = vshrl.u32 %v505_v17, 23  ;;  %v424_v42 = vmul.u32 %v422_v22, %v397_v24  ;;  %v1485_v43 = vshrl.u32 %v72_v18, 16 }
  0x56   :  { %v401_v34 = vmul.u32 %v399_v27, %v397_v24  ;;  %v402_v35 = vmul.u32 %v400_v31, %v397_v24  ;;  %v403_v39 = vmul.u32 %v399_v27, %v398_v26  ;;  %v404_v44 = vmul.u32 %v400_v31, %v398_v26 }
  0x57   :  { %v1703_v32 = vshrl.u32 %v293_v3, 30  ;;  %v364_v52 = vshrl.u32 %v1541_v62, %v1632_v20  ;;  %v423_v56 = vmul.u32 %v421_v33, %v397_v24  ;;  %v425_v57 = vmul.u32 %v421_v33, %v398_v26 }
  0x58   :  { %v405_v45 = vshll.u32 %v402_v35, 16  ;;  %v407_v47 = vshll.u32 %v403_v39, 16  ;;  %v427_v61 = vshll.u32 %v424_v42, 16  ;;  %v1500_v1 = vadd.s32 4294967169, %v506_v40 }
  0x59   :  { %v295_v41 = vshll.u32 %v1703_v32, 30  ;;  %v406_v63 = vshrl.u32 %v402_v35, 16  ;;  %v426_v30 = vmul.u32 %v422_v22, %v398_v26  ;;  %v429_v58 = vshll.u32 %v425_v57, 16 }
  0x5a   :  { %vm409_vm15 = vc.u32 %v401_v34, %v405_v45  ;;  %v411_v60 = vadd.s32 %v405_v45, %v401_v34  ;;  %v385_v20 = vsel %vm383_vm11, %v373_v5, 2102212464  ;;  %vm431_vm2 = vc.u32 %v423_v56, %v427_v61 }
  0x5b   :  { %v1706_v51 = vsub.s32 %v292_v10, %v295_v41  ;;  %v410_v9 = vsel %vm409_vm15, 1, %v1547_v23  ;;  %v433_v10 = vadd.s32 %v427_v61, %v423_v56  ;;  %v408_v14 = vshrl.u32 %v403_v39, 16 }
  0x5c   :  { %v412_v50 = vadd.s32 %v410_v9, %v404_v44  ;;  %vm413_vm1 = vc.u32 %v411_v60, %v407_v47  ;;  %v428_v37 = vshrl.u32 %v424_v42, 16  ;;  %v432_v13 = vsel %vm431_vm2, 1, %v1547_v23 }
  0x5d   :  { %v298_v7 = vsub.s32 0, %v1706_v51  ;;  %vm297_vm0 = vcmp.lt.s32.totalorder %v1706_v51, 0  ;;  %v414_v53 = vsel %vm413_vm1, 1, %v1547_v23  ;;  %v434_v17 = vadd.s32 %v432_v13, %v426_v30 }
  0x5e   :  { %v416_v25 = vadd.s32 %v414_v53, %v412_v50  ;;  %vm435_vm3 = vc.u32 %v433_v10, %v429_v58  ;;  %v512_v3 = vadd.s32 1, %v1500_v1  ;;  %v384_v21 = vsel %vm380_vm10, %v364_v52, %v1650_v48 }
  0x5f   :  { %v299_v15 = vsel %vm297_vm0, %v298_v7, %v1706_v51  ;;  %v386_v5 = vsel %vm382_vm12, %v1654_v55, %v385_v20  ;;  %v436_v24 = vsel %vm435_vm3, 1, %v1547_v23  ;;  %v430_v26 = vshrl.u32 %v425_v57, 16 }
  0x60   :  { %v417_v22 = vadd.s32 %v416_v25, %v406_v63  ;;  %v438_v27 = vadd.s32 %v436_v24, %v434_v17  ;;  %vm513_vm4 = vcmp.gt.s32.totalorder %v512_v3, 0  ;;  %v300_v31 = vclz %v299_v15 }
  0x61   :  { %v1727_v34 = vadd.s32 %v433_v10, %v429_v58  ;;  %v387_v35 = vsel %vm381_vm14, %v384_v21, %v386_v5  ;;  %v1731_v48 = vxor.u32 %v1485_v43, %v72_v18  ;;  %v85_v40 = vand.u32 65535, %v1569_v28 }
  0x62   :  { %v1725_v33 = vadd.s32 %v417_v22, %v408_v14  ;;  %v439_v39 = vadd.s32 %v438_v27, %v428_v37  ;;  %v514_v55 = vsel %vm513_vm4, %v512_v3, 0  ;;  %v502_v42 = vand.u32 2147483647, %v1666_v8 }
  0x63   :  { %v1495_v44 = vadd.s32 4294967294, %v300_v31  ;;  %v441_v45 = vmul.u32 %v1695_v16, %v387_v35  ;;  %v516_v52 = vand.u32 31, %v514_v55  ;;  %v86_v11 = vand.u32 65535, %v1571_v29 }
  0x64   :  { %v440_v41 = vadd.s32 %v439_v39, %v430_v26  ;;  %vm443_vm5 = vc.u32 %v1725_v33, %v1727_v34  ;;  %v89_v56 = vshll.u32 %v85_v40, 7  ;;  %v1489_v18 = vshrl.u32 %v1731_v48, 16 }
  0x65   :  { %v509_v28 = vand.u32 8388607, %v502_v42  ;;  %v1742_v57 = vshrl.u32 %v514_v55, 5  ;;  %v1744_v60 = vsub.s32 32, %v516_v52  ;;  %vm1496_vm6 = vcmp.lt.s32.totalorder %v1495_v44, 0 }
  0x66   :  { %v444_v47 = vadd.s32 1, %v440_v41  ;;  %v519_v61 = vshll.u32 %v1541_v62, %v516_v52  ;;  %v522_v1 = vshll.u32 %v1542_v0, %v516_v52  ;;  %v525_v63 = vshll.u32 %v1543_v4, %v516_v52 }
  0x67   :  { %v520_v29 = vshrl.u32 %v1542_v0, %v1744_v60  ;;  %v523_v7 = vshrl.u32 %v1543_v4, %v1744_v60  ;;  %v526_v9 = vshrl.u32 %v1544_v6, %v1744_v60  ;;  %v116_v30 = vshll.u32 %v1489_v18, 7 }
  0x68   :  { %v445_v43 = vsel %vm443_vm5, %v444_v47, %v440_v41  ;;  %v528_v58 = vshll.u32 %v1544_v6, %v516_v52  ;;  %v529_v20 = vshrl.u32 %v1545_v12, %v1744_v60  ;;  %v90_v53 = vshll.u32 %v86_v11, 7 }
  0x69   :  { %v446_v16 = vadd.s32 %v445_v43, %v441_v45  ;;  %v1758_v10 = vsel %vm1496_vm6, 0, %v1495_v44  ;;  %v510_v14 = vor.u32 8388608, %v509_v28  ;;  %vm534_vm7 = vcmp.lt.s32.totalorder %v1742_v57, 1 }
  0x6a   :  { %v1763_v37 = vor.u32 %v520_v29, %v519_v61  ;;  %v1765_v13 = vor.u32 %v523_v7, %v522_v1  ;;  %v530_v15 = vor.u32 %v529_v20, %v528_v58  ;;  %v1767_v17 = vor.u32 %v526_v9, %v525_v63 }
  0x6b   :  { %v447_v50 = vadd.s32 536870912, %v446_v16  ;;  %v531_v3 = vshll.u32 %v1545_v12, %v516_v52  ;;  %v532_v21 = vshrl.u32 %v1546_v19, %v1744_v60  ;;  %vm537_vm8 = vcmp.lt.s32.totalorder %v1742_v57, 4 }
  0x6c   :  { %v93_v5 = vor.u32 1065353216, %v89_v56  ;;  %v120_v22 = vor.u32 1065353216, %v116_v30  ;;  %vm536_vm9 = vcmp.lt.s32.totalorder %v1742_v57, 3  ;;  %v543_v27 = vsel %vm537_vm8, %v530_v15, 920167782 }
  0x6d   :  { %v1761_v25 = vshrl.u32 %v447_v50, 30  ;;  %v533_v26 = vor.u32 %v532_v21, %v531_v3  ;;  %v308_v31 = vsub.s32 4294967266, %v1758_v10  ;;  %vm535_vm10 = vcmp.lt.s32.totalorder %v1742_v57, 2 }
  0x6e   :  { %v542_v39 = vsel %vm534_vm7, %v1763_v37, %v1765_v13  ;;  %v87_v40 = vand.u32 65535, %v1582_v59  ;;  %v94_v55 = vor.u32 1065353216, %v90_v53  ;;  %v544_v41 = vsel %vm536_vm9, %v1767_v17, %v543_v27 }
  0x6f   :  { %v449_v24 = vshll.u32 %v1761_v25, 30  ;;  %v1789_v44 = vshll.u32 %v510_v14, 8  ;;  %v101_v45 = vsub.f32 2.0, %v93_v5  ;;  %v1493_v47 = vadd.f32 -1.0, %v120_v22 }
  0x70   :  { %v288_v11 = vadd.s32 %v1648_v46, %v1662_v2  ;;  %v545_v56 = vsel %vm535_vm10, %v542_v39, %v544_v41  ;;  %v546_v59 = vsel %vm534_vm7, %v1765_v13, %v1767_v17  ;;  %v547_v18 = vsel %vm537_vm8, %v533_v26, 1326507024 }
  0x71   :  { %v1778_v35 = vsub.s32 %v446_v16, %v449_v24  ;;  %v304_v43 = vsub.s32 32, %v1758_v10  ;;  %v309_v28 = vadd.s32 127, %v308_v31  ;;  %v548_v61 = vsel %vm536_vm9, %v530_v15, %v547_v18 }
  0x72   :  { %v88_v46 = vand.u32 65535, %v1731_v48  ;;  %v549_v1 = vsel %vm535_vm10, %v546_v59, %v548_v61  ;;  %v551_v29 = vand.u32 65535, %v1789_v44  ;;  %v552_v7 = vshrl.u32 %v1789_v44, 16 }
  0x73   :  { %vm451_vm11 = vcmp.lt.s32.totalorder %v1778_v35, 0  ;;  %v452_v52 = vsub.s32 0, %v1778_v35  ;;  %v553_v63 = vand.u32 65535, %v549_v1  ;;  %v554_v9 = vshrl.u32 %v549_v1, 16 }
  0x74   :  { %v576_v30 = vshrl.u32 %v545_v56, 16  ;;  %v102_v50 = vsub.f32 2.0, %v94_v55  ;;  %1525 = vlog2.f32 %v101_v45  ;;  %v1812_v20 = vmul.f32 6.2831855, %v1493_v47 }
  0x75   :  { %v453_v16 = vsel %vm451_vm11, %v452_v52, %v1778_v35  ;;  %v305_v53 = vshll.u32 %v1706_v51, %v1758_v10  ;;  %v306_v48 = vshrl.u32 %v288_v11, %v304_v43  ;;  %v310_v14 = vshll.u32 %v309_v28, 23 }
  0x76   :  { %v454_v2 = vclz %v453_v16  ;;  %v1816_v15 = vshll.u32 %v87_v40, 7  ;;  %v556_v3 = vmul.u32 %v554_v9, %v551_v29  ;;  %v575_v21 = vand.u32 65535, %v545_v56 }
  0x77   :  { %v1818_v5 = vshll.u32 %v88_v46, 7  ;;  %v1820_v24 = vmul.u32 %v553_v63, %v552_v7  ;;  %v1822_v26 = vmul.u32 %v576_v30, %v551_v29  ;;  %v442_v27 = vadd.s32 %v1727_v34, %v1725_v33 }
  0x78   :  { %v1498_v58 = vadd.s32 4294967294, %v454_v2  ;;  %v555_v51 = vmul.u32 %v553_v63, %v551_v29  ;;  %1527 = vlog2.f32 %v102_v50  ;;  %v307_v10 = vor.u32 %v306_v48, %v305_v53 }
  0x79   :  { %v311_v40 = vor.u32 4788187, %v310_v14  ;;  %v659_v55 = vand.u32 2139095040, %v1812_v20  ;;  %v558_v47 = vmul.u32 %v554_v9, %v552_v7  ;;  %v559_v52 = vshll.u32 %v556_v3, 16 }
  0x7a   :  { %vm1499_vm12 = vcmp.lt.s32.totalorder %v1498_v58, 0  ;;  %v1526_v41 = vpop.eup %1525  ;;  %v577_v11 = vmul.u32 %v575_v21, %v551_v29  ;;  %v561_v59 = vshll.u32 %v1820_v24, 16  ;;  %v579_v18 = vmul.u32 %v575_v21, %v552_v7 }
  0x7b   :  { %v457_v22 = vsel %vm1499_vm12, 0, %v1498_v58  ;;  %v581_v33 = vshll.u32 %v1822_v26, 16  ;;  %vm563_vm13 = vc.u32 %v555_v51, %v559_v52  ;;  %v565_v28 = vadd.s32 %v559_v52, %v555_v51 }
  0x7c   :  { %v458_v31 = vsub.s32 32, %v457_v22  ;;  %v462_v39 = vsub.s32 4294967266, %v457_v22  ;;  %v459_v56 = vshll.u32 %v1778_v35, %v457_v22  ;;  %v134_v16 = vmul.f32 0.6931472, %v1526_v41 }
  0x7d   :  { %v312_v61 = vand.u32 2147483647, %v311_v40  ;;  %v314_v46 = vcvt.s32.f32 %v307_v10  ;;  %v564_v2 = vsel %vm563_vm13, 1, %v1547_v23  ;;  %v560_v1 = vshrl.u32 %v556_v3, 16 }
  0x7e   :  { %v463_v45 = vadd.s32 127, %v462_v39  ;;  %v460_v34 = vshrl.u32 %v442_v27, %v458_v31  ;;  %v566_v63 = vadd.s32 %v564_v2, %v558_v47  ;;  %vm567_vm14 = vc.u32 %v565_v28, %v561_v59  ;;  %v1528_v9 = vpop.eup %1527 }
  0x7f   :  { %v580_v29 = vmul.u32 %v576_v30, %v552_v7  ;;  %v518_v35 = vshrl.u32 %v1541_v62, %v1744_v60  ;;  %v568_v50 = vsel %vm567_vm14, 1, %v1547_v23  ;;  %v583_v58 = vshll.u32 %v579_v18, 16 }
  0x80   :  { %v464_v43 = vshll.u32 %v463_v45, 23  ;;  %v660_v53 = vshrl.u32 %v659_v55, 23  ;;  %v461_v48 = vor.u32 %v460_v34, %v459_v56  ;;  %v570_v21 = vadd.s32 %v568_v50, %v566_v63 }
  0x81   :  { %vm585_vm15 = vc.u32 %v577_v11, %v581_v33  ;;  %v315_v22 = vmul.f32 %v314_v46, %v312_v61  ;;  %v539_v3 = vsel %vm537_vm8, %v1767_v17, 2102212464  ;;  %v587_v7 = vadd.s32 %v581_v33, %v577_v11 }
  0x82   :  { %v465_v14 = vor.u32 4788187, %v464_v43  ;;  %v586_v27 = vsel %vm585_vm15, 1, %v1547_v23  ;;  %v136_v30 = vmul.f32 0.6931472, %v1528_v9  ;;  %v562_v31 = vshrl.u32 %v1820_v24, 16 }
  0x83   :  { %v571_v60 = vadd.s32 %v570_v21, %v560_v1  ;;  %v588_v39 = vadd.s32 %v586_v27, %v580_v29  ;;  %v538_v51 = vsel %vm534_vm7, %v518_v35, %v1763_v37  ;;  %v582_v10 = vshrl.u32 %v1822_v26, 16 }
  0x84   :  { %vm589_vm0 = vc.u32 %v587_v7, %v583_v58  ;;  %v1503_v40 = vadd.s32 4294967169, %v660_v53  ;;  %v466_v55 = vand.u32 2147483647, %v465_v14  ;;  %v468_v41 = vcvt.s32.f32 %v461_v48 }
  0x85   :  { %v540_v17 = vsel %vm536_vm9, %v1765_v13, %v539_v3  ;;  %v590_v45 = vsel %vm589_vm0, 1, %v1547_v23  ;;  %v316_v47 = vxor.u32 2147483648, %v315_v22  ;;  %v584_v24 = vshrl.u32 %v579_v18, 16 }
  0x86   :  { %v592_v52 = vadd.s32 %v590_v45, %v588_v39  ;;  %v666_v11 = vadd.s32 1, %v1503_v40  ;;  %v95_v56 = vor.u32 1065353216, %v1816_v15  ;;  %vm196_vm1 = vcmp.lt.s32.totalorder %v1575_v38, 0 }
  0x87   :  { %v1849_v37 = vadd.s32 %v571_v60, %v562_v31  ;;  %v1851_v26 = vadd.s32 %v587_v7, %v583_v58  ;;  %v1853_v59 = vmul.f32 -0.02, %v134_v16  ;;  %v541_v33 = vsel %vm535_vm10, %v538_v51, %v540_v17 }
  0x88   :  { %v593_v13 = vadd.s32 %v592_v52, %v582_v10  ;;  %vm667_vm2 = vcmp.gt.s32.totalorder %v666_v11, 0  ;;  %v1857_v34 = vmul.f32 -0.02, %v136_v30  ;;  %vm1861_vm3 = vcmp.le.f32.partialorder %v194_v54, 0.7853982 }
  0x89   :  { %v469_v15 = vmul.f32 %v468_v41, %v466_v55  ;;  %v668_v43 = vsel %vm667_vm2, %v666_v11, 0  ;;  %v317_v28 = vsel %vm196_vm1, %v316_v47, %v315_v22  ;;  %v656_v61 = vand.u32 2147483647, %v1812_v20 }
  0x8a   :  { %v594_v16 = vadd.s32 %v593_v13, %v584_v24  ;;  %v670_v57 = vand.u32 31, %v668_v43  ;;  %v96_v46 = vor.u32 1065353216, %v1818_v5  ;;  %v595_v2 = vmul.u32 %v1789_v44, %v541_v33 }
  0x8b   :  { %vm597_vm4 = vc.u32 %v1849_v37, %v1851_v26  ;;  %v103_v54 = vsub.f32 2.0, %v95_v56  ;;  %1529 = vrsqrt.f32 %v1853_v59  ;;  %v1879_v29 = vsel %vm1861_vm3, %v1575_v38, %v317_v28 }
  0x8c   :  { %v598_v1 = vadd.s32 1, %v594_v16  ;;  %v1873_v63 = vsub.s32 32, %v670_v57  ;;  %1531 = vrsqrt.f32 %v1857_v34  ;;  %vm350_vm5 = vcmp.lt.s32.totalorder %v1578_v49, 0 }
  0x8d   :  { %v470_v5 = vxor.u32 2147483648, %v469_v15  ;;  %v663_v9 = vand.u32 8388607, %v656_v61  ;;  %v673_v35 = vshll.u32 %v1541_v62, %v670_v57  ;;  %v676_v50 = vshll.u32 %v1542_v0, %v670_v57 }
  0x8e   :  { %v599_v44 = vsel %vm597_vm4, %v598_v1, %v594_v16  ;;  %v674_v53 = vshrl.u32 %v1542_v0, %v1873_v63  ;;  %v677_v48 = vshrl.u32 %v1543_v4, %v1873_v63  ;;  %v682_v14 = vshll.u32 %v1544_v6, %v670_v57 }
  0x8f   :  { %v600_v58 = vadd.s32 %v599_v44, %v595_v2  ;;  %v104_v21 = vsub.f32 2.0, %v96_v46  ;;  %v1891_v22 = vshrl.u32 %v668_v43, 5  ;;  %v679_v3 = vshll.u32 %v1543_v4, %v670_v57 }
  0x90   :  { %v680_v27 = vshrl.u32 %v1544_v6, %v1873_v63  ;;  %v1898_v7 = vmul.f32 %v1879_v29, %v1879_v29  ;;  %vm1902_vm6 = vcmp.le.f32.partialorder %v348_v36, 0.7853982  ;;  %v683_v31 = vshrl.u32 %v1545_v12, %v1873_v63 }
  0x91   :  { %v601_v30 = vadd.s32 536870912, %v600_v58  ;;  %v1908_v60 = vpop.eup %1529  ;;  %v471_v4 = vsel %vm350_vm5, %v470_v5, %v469_v15  ;;  %v664_v6 = vor.u32 8388608, %v663_v9  ;;  %v685_v39 = vshll.u32 %v1545_v12, %v670_v57 }
  0x92   :  { %v686_v51 = vshrl.u32 %v1546_v19, %v1873_v63  ;;  %v1915_v10 = vpop.eup %1531  ;;  %v1919_v40 = vor.u32 %v674_v53, %v673_v35  ;;  %v1921_v55 = vor.u32 %v677_v48, %v676_v50  ;;  %v684_v41 = vor.u32 %v683_v31, %v682_v14 }
  0x93   :  { %v1917_v36 = vshrl.u32 %v601_v30, 30  ;;  %v1923_v17 = vor.u32 %v680_v27, %v679_v3  ;;  %vm688_vm7 = vcmp.lt.s32.totalorder %v1891_v22, 1  ;;  %vm691_vm8 = vcmp.lt.s32.totalorder %v1891_v22, 4 }
  0x94   :  { %1533 = vlog2.f32 %v103_v54  ;;  %v330_v12 = vmul.f32 -0.00019511016, %v1898_v7  ;;  %vm690_vm9 = vcmp.lt.s32.totalorder %v1891_v22, 3  ;;  %v1933_v45 = vsel %vm1902_vm6, %v1578_v49, %v471_v4 }
  0x95   :  { %v603_v19 = vshll.u32 %v1917_v36, 30  ;;  %v687_v47 = vor.u32 %v686_v51, %v685_v39  ;;  %v697_v24 = vsel %vm691_vm8, %v684_v41, 920167782  ;;  %v1937_v52 = vshll.u32 %v664_v6, 8 }
  0x96   :  { %1535 = vlog2.f32 %v104_v21  ;;  %vm689_vm10 = vcmp.lt.s32.totalorder %v1891_v22, 2  ;;  %v696_v56 = vsel %vm688_vm7, %v1919_v40, %v1921_v55  ;;  %v146_v33 = vmul.f32 %v1908_v60, %v1853_v59 }
  0x97   :  { %v604_v11 = vsub.s32 %v600_v58, %v603_v19  ;;  %v1948_v13 = vmul.f32 %v1915_v10, %v1857_v34  ;;  %v323_v15 = vmul.f32 -0.001358992, %v1898_v7  ;;  %v698_v43 = vsel %vm690_vm9, %v1923_v17, %v697_v24 }
  0x98   :  { %v1956_v28 = vmul.f32 %v1933_v45, %v1933_v45  ;;  %v700_v57 = vsel %vm688_vm7, %v1921_v55, %v1923_v17  ;;  %v331_v46 = vadd.f32 0.008332121, %v330_v12  ;;  %v699_v2 = vsel %vm689_vm10, %v696_v56, %v698_v43 }
  0x99   :  { %vm605_vm11 = vcmp.lt.s32.totalorder %v604_v11, 0  ;;  %v606_v16 = vsub.s32 0, %v604_v11  ;;  %v701_v54 = vsel %vm691_vm8, %v687_v47, 1326507024  ;;  %v705_v1 = vand.u32 65535, %v1937_v52 }
  0x9a   :  { %v1967_v5 = vpop.eup %1533  ;;  %v477_v44 = vmul.f32 -0.001358992, %v1956_v28  ;;  %v702_v35 = vsel %vm690_vm9, %v684_v41, %v701_v54  ;;  %v706_v50 = vshrl.u32 %v1937_v52, 16  ;;  %v729_v48 = vand.u32 65535, %v699_v2 }
  0x9b   :  { %v607_v9 = vsel %vm605_vm11, %v606_v16, %v604_v11  ;;  %v703_v53 = vsel %vm689_vm10, %v700_v57, %v702_v35  ;;  %v730_v14 = vshrl.u32 %v699_v2, 16  ;;  %v1978_v3 = vmul.f32 %v1908_v60, %v146_v33 }
  0x9c   :  { %v608_v58 = vclz %v607_v9  ;;  %v1975_v21 = vpop.eup %1535  ;;  %v324_v27 = vadd.f32 0.041655596, %v323_v15  ;;  %v707_v30 = vand.u32 65535, %v703_v53  ;;  %v708_v31 = vshrl.u32 %v703_v53, 16 }
  0x9d   :  { %v332_v4 = vmul.f32 %v331_v46, %v1898_v7  ;;  %v596_v6 = vadd.s32 %v1851_v26, %v1849_v37  ;;  %v732_v51 = vmul.u32 %v730_v14, %v705_v1  ;;  %v484_v41 = vmul.f32 -0.00019511016, %v1956_v28 }
  0x9e   :  { %v1501_v39 = vadd.s32 4294967294, %v608_v58  ;;  %v709_v12 = vmul.u32 %v707_v30, %v705_v1  ;;  %v710_v19 = vmul.u32 %v708_v31, %v705_v1  ;;  %v711_v47 = vmul.u32 %v707_v30, %v706_v50 }
  0x9f   :  { %v478_v24 = vadd.f32 0.041655596, %v477_v44  ;;  %v731_v56 = vmul.u32 %v729_v48, %v705_v1  ;;  %v733_v33 = vmul.u32 %v729_v48, %v706_v50  ;;  %v712_v15 = vmul.u32 %v708_v31, %v706_v50 }
  0xa0   :  { %vm1502_vm12 = vcmp.lt.s32.totalorder %v1501_v39, 0  ;;  %v713_v16 = vshll.u32 %v710_v19, 16  ;;  %v735_v57 = vshll.u32 %v732_v51, 16  ;;  %v715_v9 = vshll.u32 %v711_v47, 16 }
  0xa1   :  { %v611_v43 = vsel %vm1502_vm12, 0, %v1501_v39  ;;  %v485_v37 = vadd.f32 0.008332121, %v484_v41  ;;  %v672_v26 = vshrl.u32 %v1541_v62, %v1873_v63  ;;  %v734_v35 = vmul.u32 %v730_v14, %v706_v50 }
  0xa2   :  { %v612_v2 = vsub.s32 32, %v611_v43  ;;  %v613_v46 = vshll.u32 %v604_v11, %v611_v43  ;;  %v616_v54 = vsub.s32 4294967266, %v611_v43  ;;  %vm717_vm13 = vc.u32 %v709_v12, %v713_v16 }
  0xa3   :  { %v718_v44 = vsel %vm717_vm13, 1, %v1547_v23  ;;  %v719_v1 = vadd.s32 %v713_v16, %v709_v12  ;;  %v693_v48 = vsel %vm691_vm8, %v1923_v17, 2102212464  ;;  %v714_v30 = vshrl.u32 %v710_v19, 16 }
  0xa4   :  { %v614_v58 = vshrl.u32 %v596_v6, %v612_v2  ;;  %v617_v53 = vadd.s32 127, %v616_v54  ;;  %v720_v31 = vadd.s32 %v718_v44, %v712_v15  ;;  %v737_v11 = vshll.u32 %v733_v33, 16 }
  0xa5   :  { %vm721_vm14 = vc.u32 %v719_v1, %v715_v9  ;;  %vm739_vm15 = vc.u32 %v731_v56, %v735_v57  ;;  %v716_v41 = vshrl.u32 %v711_v47, 16  ;;  %v741_v50 = vadd.s32 %v735_v57, %v731_v56 }
  0xa6   :  { %v615_v39 = vor.u32 %v614_v58, %v613_v46  ;;  %v618_v43 = vshll.u32 %v617_v53, 23  ;;  %v722_v62 = vsel %vm721_vm14, 1, %v1547_v23  ;;  %v740_v63 = vsel %vm739_vm15, 1, %v1547_v23 }
  0xa7   :  { %v724_v12 = vadd.s32 %v722_v62, %v720_v31  ;;  %v742_v16 = vadd.s32 %v740_v63, %v734_v35  ;;  %v486_v2 = vmul.f32 %v485_v37, %v1956_v28  ;;  %v692_v17 = vsel %vm688_vm7, %v672_v26, %v1919_v40 }
  0xa8   :  { %v619_v14 = vor.u32 4788187, %v618_v43  ;;  %v622_v6 = vcvt.s32.f32 %v615_v39  ;;  %v736_v19 = vshrl.u32 %v732_v51, 16  ;;  %vm743_vm0 = vc.u32 %v741_v50, %v737_v11 }
  0xa9   :  { %v694_v47 = vsel %vm690_vm9, %v1921_v55, %v693_v48  ;;  %v725_v46 = vadd.s32 %v724_v12, %v714_v30  ;;  %v744_v56 = vsel %vm743_vm0, 1, %v1547_v23  ;;  %v325_v57 = vmul.f32 %v324_v27, %v1898_v7 }
  0xaa   :  { %v620_v15 = vand.u32 2147483647, %v619_v14  ;;  %v333_v54 = vadd.f32 -0.16666654, %v332_v4  ;;  %v738_v9 = vshrl.u32 %v733_v33, 16  ;;  %v746_v35 = vadd.s32 %v744_v56, %v742_v16 }
  0xab   :  { %v479_v37 = vmul.f32 %v478_v24, %v1956_v28  ;;  %v2002_v53 = vadd.s32 %v725_v46, %v716_v41  ;;  %v2004_v40 = vadd.s32 %v741_v50, %v737_v11  ;;  %v138_v51 = vmul.f32 0.6931472, %v1967_v5 }
  0xac   :  { %v623_v58 = vmul.f32 %v622_v6, %v620_v15  ;;  %v487_v26 = vadd.f32 -0.16666654, %v486_v2  ;;  %v695_v55 = vsel %vm689_vm10, %v692_v17, %v694_v47  ;;  %v747_v44 = vadd.s32 %v746_v35, %v736_v19 }
  0xad   :  { %v148_v23 = vmul.f32 0.5, %v1978_v3  ;;  %v159_v27 = vmul.f32 %v1915_v10, %v1948_v13  ;;  %v318_v4 = vsub.s32 4, %v1703_v32  ;;  %vm504_vm2 = vcmp.lt.s32.totalorder %v1666_v8, 0 }
  0xae   :  { %v326_v24 = vadd.f32 -0.4999988, %v325_v57  ;;  %v472_v33 = vsub.s32 4, %v1761_v25  ;;  %v624_v1 = vxor.u32 2147483648, %v623_v58  ;;  %v748_v48 = vadd.s32 %v747_v44, %v738_v9 }
  0xaf   :  { %v334_v5 = vmul.f32 %v333_v54, %v1898_v7  ;;  %v480_v30 = vadd.f32 -0.4999988, %v479_v37  ;;  %v749_v22 = vmul.u32 %v1937_v52, %v695_v55  ;;  %vm751_vm4 = vc.u32 %v2002_v53, %v2004_v40 }
  0xb0   :  { %v140_v3 = vmul.f32 0.6931472, %v1975_v21  ;;  %v2020_v13 = vmul.f32 -0.02, %v138_v51  ;;  %v488_v31 = vmul.f32 %v487_v26, %v1956_v28  ;;  %v752_v11 = vadd.s32 1, %v748_v48 }
  0xb1   :  { %v149_v39 = vsub.f32 1.5, %v148_v23  ;;  %v160_v43 = vmul.f32 0.5, %v159_v27  ;;  %v319_v41 = vsel %vm196_vm1, %v318_v4, %v1703_v32  ;;  %v473_v52 = vsel %vm350_vm5, %v472_v33, %v1761_v25 }
  0xb2   :  { %vm2031_vm7 = vcmp.le.f32.partialorder %v502_v42, 0.7853982  ;;  %v625_v21 = vsel %vm504_vm2, %v624_v1, %v623_v58  ;;  %v753_v63 = vsel %vm751_vm4, %v752_v11, %v748_v48  ;;  %v327_v50 = vmul.f32 %v326_v24, %v1898_v7 }
  0xb3   :  { %v335_v14 = vadd.f32 1.0, %v334_v5  ;;  %v481_v6 = vmul.f32 %v480_v30, %v1956_v28  ;;  %v754_v32 = vadd.s32 %v753_v63, %v749_v22  ;;  %v2039_v12 = vmul.f32 -0.02, %v140_v3 }
  0xb4   :  { %1537 = vrsqrt.f32 %v2020_v13  ;;  %v489_v25 = vadd.f32 1.0, %v488_v31  ;;  %v2044_v42 = vsel %vm1861_vm3, 0, %v319_v41  ;;  %v2049_v16 = vsel %vm2031_vm7, %v1666_v8, %v625_v21 }
  0xb5   :  { %v755_v2 = vadd.s32 536870912, %v754_v32  ;;  %v150_v7 = vmul.f32 %v1908_v60, %v149_v39  ;;  %v161_v17 = vsub.f32 1.5, %v160_v43  ;;  %v338_v28 = vand.u32 3, %v2044_v42 }
  0xb6   :  { %v475_v19 = vsel %vm1902_vm6, 0, %v473_v52  ;;  %v2055_v15 = vadd.f32 1.0, %v327_v50  ;;  %v2058_v18 = vmul.f32 %v335_v14, %v1879_v29  ;;  %v2060_v47 = vadd.f32 1.0, %v481_v6 }
  0xb7   :  { %v2062_v46 = vshrl.u32 %v755_v2, 30  ;;  %1539 = vrsqrt.f32 %v2039_v12  ;;  %v2066_v56 = vmul.f32 %v489_v25, %v1933_v45  ;;  %v492_v60 = vand.u32 3, %v475_v19 }
  0xb8   :  { %v2070_v57 = vmul.f32 %v2049_v16, %v2049_v16  ;;  %vm152_vm1 = vcmp.eq.f32.partialorder %v1853_v59, inf  ;;  %vm154_vm3 = vcmp.eq.f32.partialorder %v1853_v59, 0.0  ;;  %v155_v29 = vand.u32 2147483648, %v1853_v59 }
  0xb9   :  { %v757_v0 = vshll.u32 %v2062_v46, 30  ;;  %v151_v9 = vmul.f32 %v150_v7, %v1853_v59  ;;  %v162_v45 = vmul.f32 %v1915_v10, %v161_v17  ;;  %vm164_vm5 = vcmp.eq.f32.partialorder %v1857_v34, inf }
  0xba   :  { %v2076_v54 = vpop.eup %1537  ;;  %vm340_vm6 = vcmp.eq.s32.totalorder %v338_v28, 0  ;;  %v341_v35 = vxor.u32 2147483648, %v2058_v18  ;;  %v344_v37 = vxor.u32 2147483648, %v2055_v15  ;;  %v498_v58 = vxor.u32 2147483648, %v2060_v47 }
  0xbb   :  { %v758_v51 = vsub.s32 %v754_v32, %v757_v0  ;;  %vm343_vm8 = vcmp.eq.s32.totalorder %v338_v28, 2  ;;  %v495_v26 = vxor.u32 2147483648, %v2066_v56  ;;  %vm497_vm9 = vcmp.eq.s32.totalorder %v492_v60, 2 }
  0xbc   :  { %v638_v55 = vmul.f32 -0.00019511016, %v2070_v57  ;;  %v170_v44 = vmul.f32 %v2076_v54, %v2020_v13  ;;  %vm494_vm10 = vcmp.eq.s32.totalorder %v492_v60, 0  ;;  %v153_v27 = vsel %vm152_vm1, %v1853_v59, %v151_v9 }
  0xbd   :  { %vm759_vm11 = vcmp.lt.s32.totalorder %v758_v51, 0  ;;  %v760_v10 = vsub.s32 0, %v758_v51  ;;  %v2088_v23 = vpop.eup %1539  ;;  %v163_v4 = vmul.f32 %v162_v45, %v1857_v34  ;;  %vm339_vm12 = vcmp.lt.s32.totalorder %v338_v28, 2 }
  0xbe   :  { %vm493_vm13 = vcmp.lt.s32.totalorder %v492_v60, 2  ;;  %v342_v24 = vsel %vm340_vm6, %v2055_v15, %v341_v35  ;;  %v345_v33 = vsel %vm343_vm8, %v344_v37, %v2058_v18  ;;  %v499_v1 = vsel %vm497_vm9, %v498_v58, %v2066_v56 }
  0xbf   :  { %v761_v48 = vsel %vm759_vm11, %v760_v10, %v758_v51  ;;  %v496_v5 = vsel %vm494_vm10, %v2060_v47, %v495_v26  ;;  %v631_v30 = vmul.f32 -0.001358992, %v2070_v57  ;;  %v639_v22 = vadd.f32 0.008332121, %v638_v55 }
  0xc0   :  { %v762_v3 = vclz %v761_v48  ;;  %vm166_vm14 = vcmp.eq.f32.partialorder %v1857_v34, 0.0  ;;  %v167_v31 = vand.u32 2147483648, %v1857_v34  ;;  %v171_v11 = vmul.f32 %v2076_v54, %v170_v44 }
  0xc1   :  { %v182_v39 = vmul.f32 %v2088_v23, %v2039_v12  ;;  %v2113_v43 = vsel %vm154_vm3, %v155_v29, %v153_v27  ;;  %v165_v41 = vsel %vm164_vm5, %v1857_v34, %v163_v4  ;;  %vm337_vm15 = vweird.f32 %v1575_v38 }
  0xc2   :  { %v1504_v52 = vadd.s32 4294967294, %v762_v3  ;;  %v346_v21 = vsel %vm339_vm12, %v342_v24, %v345_v33  ;;  %vm491_vm0 = vweird.f32 %v1578_v49  ;;  %v500_v63 = vsel %vm493_vm13, %v496_v5, %v499_v1 }
  0xc3   :  { %v1131_v50 = vadd.s32 3, %v475_v19  ;;  %v632_v14 = vadd.f32 0.041655596, %v631_v30  ;;  %v640_v6 = vmul.f32 %v639_v22, %v2070_v57  ;;  %v750_v59 = vadd.s32 %v2004_v40, %v2002_v53 }
  0xc4   :  { %vm1505_vm4 = vcmp.lt.s32.totalorder %v1504_v52, 0  ;;  %v168_v32 = vsel %vm166_vm14, %v167_v31, %v165_v41  ;;  %v976_v2 = vadd.s32 3, %v2044_v42  ;;  %v347_v17 = vsel %vm337_vm15, nan, %v346_v21 }
  0xc5   :  { %v765_v25 = vsel %vm1505_vm4, 0, %v1504_v52  ;;  %v1132_v7 = vand.u32 3, %v1131_v50  ;;  %v501_v29 = vsel %vm491_vm0, nan, %v500_v63  ;;  %v626_v0 = vsub.s32 4, %v1917_v36 }
  0xc6   :  { %v766_v28 = vsub.s32 32, %v765_v25  ;;  %v767_v60 = vshll.u32 %v758_v51, %v765_v25  ;;  %v770_v19 = vsub.s32 4294967266, %v765_v25  ;;  %v977_v53 = vand.u32 3, %v976_v2 }
  0xc7   :  { %vm1134_vm1 = vcmp.eq.s32.totalorder %v1132_v7, 0  ;;  %v633_v34 = vmul.f32 %v632_v14, %v2070_v57  ;;  %v641_v40 = vadd.f32 -0.16666654, %v640_v6  ;;  %vm1133_vm6 = vcmp.lt.s32.totalorder %v1132_v7, 2 }
  0xc8   :  { %v768_v9 = vshrl.u32 %v750_v59, %v766_v28  ;;  %v771_v45 = vadd.s32 127, %v770_v19  ;;  %vm979_vm3 = vcmp.eq.s32.totalorder %v977_v53, 0  ;;  %vm982_vm5 = vcmp.eq.s32.totalorder %v977_v53, 2 }
  0xc9   :  { %v1136_v42 = vsel %vm1134_vm1, %v2060_v47, %v495_v26  ;;  %v810_v44 = vmul.f32 %v347_v17, %v2113_v43  ;;  %v811_v10 = vmul.f32 %v501_v29, %v168_v32  ;;  %vm978_vm8 = vcmp.lt.s32.totalorder %v977_v53, 2 }
  0xca   :  { %v769_v55 = vor.u32 %v768_v9, %v767_v60  ;;  %v772_v51 = vshll.u32 %v771_v45, 23  ;;  %v981_v27 = vsel %vm979_vm3, %v2055_v15, %v341_v35  ;;  %v984_v4 = vsel %vm982_vm5, %v344_v37, %v2058_v18 }
  0xcb   :  { %vm1137_vm9 = vcmp.eq.s32.totalorder %v1132_v7, 2  ;;  %v818_v1 = vrot.slane %v811_v10, 6  ;;  %v985_v48 = vsel %vm978_vm8, %v981_v27, %v984_v4  ;;  %v627_v26 = vsel %vm504_vm2, %v626_v0, %v1917_v36 }
  0xcc   :  { %v773_v24 = vor.u32 4788187, %v772_v51  ;;  %v776_v33 = vcvt.s32.f32 %v769_v55  ;;  %v634_v5 = vadd.f32 -0.4999988, %v633_v34  ;;  %v642_v30 = vmul.f32 %v641_v40, %v2070_v57 }
  0xcd   :  { %vm821_vm10 = vcmask 1041408   ;;  %v1139_v15 = vsel %vm1137_vm9, %v498_v58, %v2066_v56  ;;  %v172_v18 = vmul.f32 0.5, %v171_v11  ;;  %v183_v37 = vmul.f32 %v2088_v23, %v182_v39 }
  0xce   :  { %v774_v22 = vand.u32 2147483647, %v773_v24  ;;  %v2147_v35 = vsel %vm821_vm10, %v810_v44, %v818_v1  ;;  %v986_v3 = vsel %vm337_vm15, nan, %v985_v48  ;;  %v1140_v36 = vsel %vm1133_vm6, %v1136_v42, %v1139_v15 }
  0xcf   :  { %v629_v31 = vsel %vm2031_vm7, 0, %v627_v26  ;;  %vm658_vm2 = vcmp.lt.s32.totalorder %v1812_v20, 0  ;;  %v1141_v52 = vsel %vm491_vm0, nan, %v1140_v36  ;;  %v635_v47 = vmul.f32 %v634_v5, %v2070_v57 }
  0xd0   :  { %v777_v41 = vmul.f32 %v776_v33, %v774_v22  ;;  %v643_v56 = vadd.f32 1.0, %v642_v30  ;;  %v780_v58 = vsub.s32 4, %v2062_v46  ;;  %v1453_v11 = vmul.f32 %v1141_v52, %v168_v32 }
  0xd1   :  { %vm2165_vm11 = vcmp.le.f32.partialorder %v656_v61, 0.7853982  ;;  %v1452_v39 = vmul.f32 %v986_v3, %v2113_v43  ;;  %v184_v21 = vmul.f32 0.5, %v183_v37  ;;  %v1286_v63 = vadd.s32 3, %v629_v31 }
  0xd2   :  { %v778_v62 = vxor.u32 2147483648, %v777_v41  ;;  %v173_v50 = vsub.f32 1.5, %v172_v18  ;;  %v1460_v57 = vrot.slane %v1453_v11, 6  ;;  %v636_v14 = vadd.f32 1.0, %v635_v47 }
  0xd3   :  { %v644_v6 = vmul.f32 %v643_v56, %v2049_v16  ;;  %v781_v61 = vsel %vm658_vm2, %v780_v58, %v2062_v46  ;;  %v646_v32 = vand.u32 3, %v629_v31  ;;  %v185_v2 = vsub.f32 1.5, %v184_v21 }
  0xd4   :  { %v779_v49 = vsel %vm658_vm2, %v778_v62, %v777_v41  ;;  %v2180_v25 = vsel %vm821_vm10, %v1452_v39, %v1460_v57  ;;  %v1287_v7 = vand.u32 3, %v1286_v63  ;;  %v174_v17 = vmul.f32 %v2076_v54, %v173_v50 }
  0xd5   :  { %v782_v59 = vsel %vm2165_vm11, %v1812_v20, %v779_v49  ;;  %v783_v16 = vsel %vm2165_vm11, 0, %v781_v61  ;;  %v649_v19 = vxor.u32 2147483648, %v644_v6  ;;  %v652_v46 = vxor.u32 2147483648, %v636_v14 }
  0xd6   :  { %v784_v43 = vmul.f32 %v782_v59, %v782_v59  ;;  %vm648_vm7 = vcmp.eq.s32.totalorder %v646_v32, 0  ;;  %vm651_vm12 = vcmp.eq.s32.totalorder %v646_v32, 2  ;;  %vm176_vm13 = vcmp.eq.f32.partialorder %v2020_v13, inf }
  0xd7   :  { %vm1289_vm14 = vcmp.eq.s32.totalorder %v1287_v7, 0  ;;  %vm1292_vm15 = vcmp.eq.s32.totalorder %v1287_v7, 2  ;;  %v1441_v53 = vadd.s32 3, %v783_v16  ;;  %v175_v34 = vmul.f32 %v174_v17, %v2020_v13 }
  0xd8   :  { %v785_v28 = vmul.f32 -0.001358992, %v784_v43  ;;  %v792_v60 = vmul.f32 -0.00019511016, %v784_v43  ;;  %v186_v54 = vmul.f32 %v2088_v23, %v185_v2  ;;  %vm647_vm0 = vcmp.lt.s32.totalorder %v646_v32, 2 }
  0xd9   :  { %v650_v45 = vsel %vm648_vm7, %v636_v14, %v649_v19  ;;  %v653_v42 = vsel %vm651_vm12, %v652_v46, %v644_v6  ;;  %vm1288_vm4 = vcmp.lt.s32.totalorder %v1287_v7, 2  ;;  %v1291_v44 = vsel %vm1289_vm14, %v636_v14, %v649_v19 }
  0xda   :  { %v786_v29 = vadd.f32 0.041655596, %v785_v28  ;;  %v793_v0 = vadd.f32 0.008332121, %v792_v60  ;;  %v1294_v10 = vsel %vm1292_vm15, %v652_v46, %v644_v6  ;;  %v179_v27 = vand.u32 2147483648, %v2020_v13 }
  0xdb   :  { %v800_v4 = vand.u32 3, %v783_v16  ;;  %v1442_v24 = vand.u32 3, %v1441_v53  ;;  %v177_v33 = vsel %vm176_vm13, %v2020_v13, %v175_v34  ;;  %vm178_vm1 = vcmp.eq.f32.partialorder %v2020_v13, 0.0 }
  0xdc   :  { %v787_v40 = vmul.f32 %v786_v29, %v784_v43  ;;  %v794_v9 = vmul.f32 %v793_v0, %v784_v43  ;;  %v187_v48 = vmul.f32 %v186_v54, %v2039_v12  ;;  %vm645_vm3 = vweird.f32 %v1666_v8 }
  0xdd   :  { %v654_v26 = vsel %vm647_vm0, %v650_v45, %v653_v42  ;;  %v1295_v5 = vsel %vm1288_vm4, %v1291_v44, %v1294_v10  ;;  %vm188_vm5 = vcmp.eq.f32.partialorder %v2039_v12, inf  ;;  %vm190_vm6 = vcmp.eq.f32.partialorder %v2039_v12, 0.0 }
  0xde   :  { %v788_v55 = vadd.f32 -0.4999988, %v787_v40  ;;  %v795_v51 = vadd.f32 -0.16666654, %v794_v9  ;;  %v180_v15 = vsel %vm178_vm1, %v179_v27, %v177_v33  ;;  %v191_v18 = vand.u32 2147483648, %v2039_v12 }
  0xdf   :  { %vm805_vm8 = vcmp.eq.s32.totalorder %v800_v4, 2  ;;  %vm1447_vm9 = vcmp.eq.s32.totalorder %v1442_v24, 2  ;;  %v655_v13 = vsel %vm645_vm3, nan, %v654_v26  ;;  %v1296_v36 = vsel %vm645_vm3, nan, %v1295_v5 }
  0xe0   :  { %v789_v23 = vmul.f32 %v788_v55, %v784_v43  ;;  %v796_v1 = vmul.f32 %v795_v51, %v784_v43  ;;  %v189_v8 = vsel %vm188_vm5, %v2039_v12, %v187_v48  ;;  %vm801_vm10 = vcmp.lt.s32.totalorder %v800_v4, 2  ;;  %v831_v12 = vld [vmem:[%s2218_s1 + $0x8] sm:$0xff] }
  0xe1   :  { %vm802_vm2 = vcmp.eq.s32.totalorder %v800_v4, 0  ;;  %vm1444_vm11 = vcmp.eq.s32.totalorder %v1442_v24, 0  ;;  %vm1443_vm7 = vcmp.lt.s32.totalorder %v1442_v24, 2  ;;  %vm799_vm12 = vweird.f32 %v1812_v20  ;;  %v193_v20 = vld [vmem:[%s2218_s1] sm:$0xff] }
  0xe2   :  { %v790_v30 = vadd.f32 1.0, %v789_v23  ;;  %v797_v22 = vadd.f32 1.0, %v796_v1  ;;  %v812_v47 = vmul.f32 %v655_v13, %v180_v15  ;;  %v1454_v56 = vmul.f32 %v1296_v36, %v180_v15 }
  0xe3   :  { %v192_v58 = vsel %vm190_vm6, %v191_v18, %v189_v8  ;;  %vm823_vm13 = vcmask 1045508   ;;  %vm825_vm14 = vcmask 1043456  }
  0xe4   :  { %v798_v37 = vmul.f32 %v797_v22, %v782_v59  ;;  %v806_v3 = vxor.u32 2147483648, %v790_v30  ;;  %v819_v49 = vrot.slane %v812_v47, 4  ;;  %v1461_v14 = vrot.slane %v1454_v56, 4 }
  0xe6   :  { %v803_v31 = vxor.u32 2147483648, %v798_v37  ;;  %v807_v41 = vsel %vm805_vm8, %v806_v3, %v798_v37  ;;  %v1449_v52 = vsel %vm1447_vm9, %v806_v3, %v798_v37 }
  0xe8   :  { %v804_v11 = vsel %vm802_vm2, %v790_v30, %v803_v31  ;;  %v1446_v38 = vsel %vm1444_vm11, %v790_v30, %v803_v31 }
  0xe9   :  { %v808_v62 = vsel %vm801_vm10, %v804_v11, %v807_v41  ;;  %v1450_v39 = vsel %vm1443_vm7, %v1446_v38, %v1449_v52 }
  0xea   :  { %v809_v21 = vsel %vm799_vm12, nan, %v808_v62  ;;  %v1451_v63 = vsel %vm799_vm12, nan, %v1450_v39 }
  0xeb   :  { %v813_v50 = vmul.f32 %v809_v21, %v192_v58  ;;  %v1455_v57 = vmul.f32 %v1451_v63, %v192_v58 }
  0xed   :  { %v820_v6 = vrot.slane %v813_v50, 2  ;;  %v1462_v61 = vrot.slane %v1455_v57, 2 }
  0xef   :  { %v824_v59 = vsel %vm823_vm13, %v819_v49, %v820_v6  ;;  %v1464_v32 = vsel %vm823_vm13, %v1461_v14, %v1462_v61 }
  0xf0   :  { %v826_v43 = vsel %vm825_vm14, %v2147_v35, %v824_v59  ;;  %v1465_v2 = vsel %vm825_vm14, %v2180_v25, %v1464_v32 }
  0xf1   :  { %v828_v7 = vadd.f32 %v826_v43, %v193_v20  ;;  %v1467_v17 = vadd.f32 %v1465_v2, %v831_v12 }
  0xf3   :  { %830 = vst [vmem:[%s2219_s2] sm:$0xff] %v828_v7 }
  0xf4   :  { %1469 = vst [vmem:[%s2219_s2 + $0x8] sm:$0xff] %v1467_v17 }

</bundles_post_ra>
